<compile_context>
chip_gen: v7x
topology: tpu7x:2x2x1
jax: 0.10.0
libtpu: 0.0.40
codegen_flags: <defaults>
</compile_context>

<pallas_src>
import jax
import jax.numpy as jnp
from jax import lax
from jax.experimental import pallas as pl
from jax.experimental.pallas import tpu as pltpu

H, W = 7, 7
HW = H * W
CIN, COUT = 128, 32
KH, KW = 3, 3
PAD = 1
GROUP_ROWS = KW * COUT  # 96 packed-weight rows per kernel-row group


def relu_conv_kernel(x_ref, w_ref, o_ref):
    # x_ref: (CIN, HW)            CHW-flattened input for one batch element (VMEM)
    # w_ref: (KH*KW*COUT, CIN)    packed weights, tap-major rows (VMEM, resident)
    # o_ref: (COUT, HW)           CHW-flattened output (VMEM)
    xr = jnp.maximum(x_ref[...], 0.0)                       # fused ReLU (VPU)

    # Boundary masks built in-kernel from a lane iota (no HBM mask input).
    lane = lax.broadcasted_iota(jnp.int32, (1, HW), 1)      # 0..48 along lanes
    lane_f = lane.astype(jnp.float32)
    # h = lane // 7, w = lane % 7, computed exactly with a +0.5 guard band.
    row_f = jnp.floor((lane_f + 0.5) * (1.0 / W))
    col_f = lane_f - W * row_f
    row_ok = {-1: lane >= W,            # needs h-1 >= 0
              0: None,
              1: lane < (H - 1) * W}    # needs h+1 <= H-1
    col_ok = {-1: col_f >= 0.5,         # needs w-1 >= 0
              0: None,
              1: col_f <= W - 1.5}      # needs w+1 <= W-1

    def group_dot(kh):
        # (96,128)@(128,49) -> (96,49) on the MXU; one per kernel row bounds vreg pressure.
        w_g = w_ref[kh * GROUP_ROWS:(kh + 1) * GROUP_ROWS, :]
        return jnp.dot(w_g, xr, preferred_element_type=jnp.float32)

    def tap(y_g, kh, kw):
        dh, dw = kh - PAD, kw - PAD
        shift = dh * W + dw
        t = y_g[kw * COUT:(kw + 1) * COUT, :]               # sublane-aligned 32-row slice
        if shift:
            # shifted[:, q] = t[:, (q + shift) mod 49]; wrapped lanes are masked below.
            t = jnp.roll(t, -shift, axis=1)
        rm, cm = row_ok[dh], col_ok[dw]
        m = rm if cm is None else (cm if rm is None else rm & cm)
        if m is not None:
            t = jnp.where(m, t, 0.0)
        return t

    # Centre row first so the centre tap (shift 0, all-valid) seeds the accumulator.
    y1 = group_dot(1)
    acc = tap(y1, 1, 1)
    acc = acc + tap(y1, 1, 0) + tap(y1, 1, 2)
    y0 = group_dot(0)
    acc = acc + tap(y0, 0, 0) + tap(y0, 0, 1) + tap(y0, 0, 2)
    y2 = group_dot(2)
    acc = acc + tap(y2, 2, 0) + tap(y2, 2, 1) + tap(y2, 2, 2)
    o_ref[...] = acc


def pack_weights(w_oihw):
    # (COUT, CIN, KH, KW) -> (KH*KW*COUT, CIN): row = (kh*KW + kw)*COUT + o, col = c.
    # Hoisted out of the hot path: done once per module.
    return jnp.transpose(w_oihw, (2, 3, 0, 1)).reshape(KH * KW * COUT, CIN)


@jax.jit
def relu_conv2d(x_nchw, w_packed):
    """x_nchw: (B, 128, 7, 7) f32 -> (B, 32, 7, 7) f32 (ReLU fused into the conv)."""
    B = x_nchw.shape[0]
    x_flat = x_nchw.reshape(B, CIN, HW)          # contiguous collapse: free bitcast
    out_flat = pl.pallas_call(
        relu_conv_kernel,
        out_shape=jax.ShapeDtypeStruct((B, COUT, HW), jnp.float32),
        grid=(B,),
        in_specs=[
            pl.BlockSpec((None, CIN, HW), lambda b: (b, 0, 0)),
            # Constant index_map: the 147 KB weight tile is DMA'd once and stays resident.
            pl.BlockSpec((KH * KW * COUT, CIN), lambda b: (0, 0)),
        ],
        out_specs=pl.BlockSpec((None, COUT, HW), lambda b: (b, 0, 0)),
        compiler_params=pltpu.CompilerParams(dimension_semantics=("parallel",)),
        cost_estimate=pl.CostEstimate(
            flops=2 * COUT * CIN * KH * KW * HW * B,
            bytes_accessed=KH * KW * COUT * CIN * 4 + B * (CIN + COUT) * HW * 4,
            transcendentals=0,
        ),
    )(x_flat, w_packed)
    return out_flat.reshape(B, COUT, H, W)       # contiguous expand: free bitcast


if __name__ == "__main__":
    key = jax.random.PRNGKey(0)
    kx, kw_key = jax.random.split(key)
    x = jax.random.normal(kx, (1, CIN, H, W), dtype=jnp.float32)      # spec input shape
    w = jax.random.normal(kw_key, (COUT, CIN, KH, KW), dtype=jnp.float32) * 0.05

    w_packed = pack_weights(w)                   # once-per-module weight repack
    out = jax.block_until_ready(relu_conv2d(x, w_packed))
    assert out.shape == (1, COUT, H, W), out.shape

    ref = lax.conv_general_dilated(
        jnp.maximum(x, 0.0), w, window_strides=(1, 1),
        padding=((PAD, PAD), (PAD, PAD)),
        dimension_numbers=("NCHW", "OIHW", "NCHW"))
    err = float(jnp.max(jnp.abs(out - ref)))
    assert jnp.allclose(out, ref, atol=1e-4, rtol=1e-4), err

    # Also exercise the batched grid path (weights stay resident across grid steps).
    xb = jax.random.normal(jax.random.PRNGKey(1), (2, CIN, H, W), dtype=jnp.float32)
    outb = jax.block_until_ready(relu_conv2d(xb, w_packed))
    refb = lax.conv_general_dilated(
        jnp.maximum(xb, 0.0), w, window_strides=(1, 1),
        padding=((PAD, PAD), (PAD, PAD)),
        dimension_numbers=("NCHW", "OIHW", "NCHW"))
    assert jnp.allclose(outb, refb, atol=1e-4, rtol=1e-4)

    print("KERNEL_OK")
</pallas_src>

<mosaic_0001>
module attributes {stable_mosaic.version = 11 : i64} {
  func.func @relu_conv_kernel(%arg0: i32, %arg1: memref<1x128x49xf32, #tpu.memory_space<vmem>>, %arg2: memref<288x128xf32, #tpu.memory_space<vmem>>, %arg3: memref<1x32x49xf32, #tpu.memory_space<vmem>>) attributes {dimension_semantics = [#tpu.dimension_semantics<parallel>], iteration_bounds = array<i64: 1>, scalar_prefetch = 0 : i64, scratch_operands = 0 : i64, tpu.core_type = #tpu.core_type<tc>, window_params = [{transform_indices = @transform_0, window_bounds = array<i64: 1, 128, 49>}, {pipeline_mode = #tpu.pipeline_mode<synchronous>, transform_indices = @transform_1, window_bounds = array<i64: 288, 128>}, {transform_indices = @transform_2, window_bounds = array<i64: 1, 32, 49>}]} {
    %c0 = arith.constant 0 : index
    %c0_0 = arith.constant 0 : index
    %c0_1 = arith.constant 0 : index
    %0 = vector.load %arg1[%c0, %c0_0, %c0_1] : memref<1x128x49xf32, #tpu.memory_space<vmem>>, vector<1x128x49xf32>
    %1 = vector.shape_cast %0 : vector<1x128x49xf32> to vector<128x49xf32>
    %cst = arith.constant 0.000000e+00 : f32
    %2 = vector.broadcast %cst : f32 to vector<128x49xf32>
    %3 = arith.maximumf %1, %2 : vector<128x49xf32>
    %4 = tpu.iota {dimensions = array<i32: 1>} : vector<1x49xi32>
    %5 = arith.sitofp %4 : vector<1x49xi32> to vector<1x49xf32>
    %cst_2 = arith.constant 5.000000e-01 : f32
    %6 = vector.broadcast %cst_2 : f32 to vector<1x49xf32>
    %7 = arith.addf %5, %6 : vector<1x49xf32>
    %cst_3 = arith.constant 0.142857149 : f32
    %8 = vector.broadcast %cst_3 : f32 to vector<1x49xf32>
    %9 = arith.mulf %7, %8 : vector<1x49xf32>
    %10 = math.floor %9 : vector<1x49xf32>
    %cst_4 = arith.constant 7.000000e+00 : f32
    %11 = vector.broadcast %cst_4 : f32 to vector<1x49xf32>
    %12 = arith.mulf %11, %10 : vector<1x49xf32>
    %13 = arith.subf %5, %12 : vector<1x49xf32>
    %c7_i32 = arith.constant 7 : i32
    %14 = vector.broadcast %c7_i32 : i32 to vector<1x49xi32>
    %15 = arith.cmpi sge, %4, %14 : vector<1x49xi32>
    %c42_i32 = arith.constant 42 : i32
    %16 = vector.broadcast %c42_i32 : i32 to vector<1x49xi32>
    %17 = arith.cmpi slt, %4, %16 : vector<1x49xi32>
    %cst_5 = arith.constant 5.000000e-01 : f32
    %18 = vector.broadcast %cst_5 : f32 to vector<1x49xf32>
    %19 = arith.cmpf oge, %13, %18 : vector<1x49xf32>
    %cst_6 = arith.constant 5.500000e+00 : f32
    %20 = vector.broadcast %cst_6 : f32 to vector<1x49xf32>
    %21 = arith.cmpf ole, %13, %20 : vector<1x49xf32>
    %c96 = arith.constant 96 : index
    %c0_7 = arith.constant 0 : index
    %22 = vector.load %arg2[%c96, %c0_7] : memref<288x128xf32, #tpu.memory_space<vmem>>, vector<96x128xf32>
    %cst_8 = arith.constant dense<0.000000e+00> : vector<96x49xf32>
    %23 = tpu.matmul %22, %3, %cst_8 {dimension_numbers = #tpu.dot_dimension_numbers<[1], [0], [0], [1], [0, 0, 1, 1], [], []>} : vector<96x128xf32>, vector<128x49xf32>, vector<96x49xf32> -> vector<96x49xf32>
    %24 = vector.extract_strided_slice %23 {offsets = [32, 0], sizes = [32, 49], strides = [1, 1]} : vector<96x49xf32> to vector<32x49xf32>
    %25 = vector.extract_strided_slice %23 {offsets = [0, 0], sizes = [32, 49], strides = [1, 1]} : vector<96x49xf32> to vector<32x49xf32>
    %26 = vector.extract_strided_slice %25 {offsets = [0, 48], sizes = [32, 1], strides = [1, 1]} : vector<32x49xf32> to vector<32x1xf32>
    %27 = vector.extract_strided_slice %25 {offsets = [0, 0], sizes = [32, 48], strides = [1, 1]} : vector<32x49xf32> to vector<32x48xf32>
    %28 = tpu.concatenate %26, %27 in 1 : vector<32x1xf32>, vector<32x48xf32> -> vector<32x49xf32>
    %cst_9 = arith.constant 0.000000e+00 : f32
    %29 = vector.shape_cast %19 : vector<1x49xi1> to vector<1x49xi1>
    %30 = vector.broadcast %29 : vector<1x49xi1> to vector<32x49xi1>
    %31 = vector.broadcast %cst_9 : f32 to vector<32x49xf32>
    %32 = arith.select %30, %28, %31 : vector<32x49xi1>, vector<32x49xf32>
    %33 = arith.addf %24, %32 : vector<32x49xf32>
    %34 = vector.extract_strided_slice %23 {offsets = [64, 0], sizes = [32, 49], strides = [1, 1]} : vector<96x49xf32> to vector<32x49xf32>
    %35 = vector.extract_strided_slice %34 {offsets = [0, 1], sizes = [32, 48], strides = [1, 1]} : vector<32x49xf32> to vector<32x48xf32>
    %36 = vector.extract_strided_slice %34 {offsets = [0, 0], sizes = [32, 1], strides = [1, 1]} : vector<32x49xf32> to vector<32x1xf32>
    %37 = tpu.concatenate %35, %36 in 1 : vector<32x48xf32>, vector<32x1xf32> -> vector<32x49xf32>
    %cst_10 = arith.constant 0.000000e+00 : f32
    %38 = vector.shape_cast %21 : vector<1x49xi1> to vector<1x49xi1>
    %39 = vector.broadcast %38 : vector<1x49xi1> to vector<32x49xi1>
    %40 = vector.broadcast %cst_10 : f32 to vector<32x49xf32>
    %41 = arith.select %39, %37, %40 : vector<32x49xi1>, vector<32x49xf32>
    %42 = arith.addf %33, %41 : vector<32x49xf32>
    %c0_11 = arith.constant 0 : index
    %c0_12 = arith.constant 0 : index
    %43 = vector.load %arg2[%c0_11, %c0_12] : memref<288x128xf32, #tpu.memory_space<vmem>>, vector<96x128xf32>
    %cst_13 = arith.constant dense<0.000000e+00> : vector<96x49xf32>
    %44 = tpu.matmul %43, %3, %cst_13 {dimension_numbers = #tpu.dot_dimension_numbers<[1], [0], [0], [1], [0, 0, 1, 1], [], []>} : vector<96x128xf32>, vector<128x49xf32>, vector<96x49xf32> -> vector<96x49xf32>
    %45 = vector.extract_strided_slice %44 {offsets = [0, 0], sizes = [32, 49], strides = [1, 1]} : vector<96x49xf32> to vector<32x49xf32>
    %46 = vector.extract_strided_slice %45 {offsets = [0, 41], sizes = [32, 8], strides = [1, 1]} : vector<32x49xf32> to vector<32x8xf32>
    %47 = vector.extract_strided_slice %45 {offsets = [0, 0], sizes = [32, 41], strides = [1, 1]} : vector<32x49xf32> to vector<32x41xf32>
    %48 = tpu.concatenate %46, %47 in 1 : vector<32x8xf32>, vector<32x41xf32> -> vector<32x49xf32>
    %49 = arith.andi %15, %19 : vector<1x49xi1>
    %cst_14 = arith.constant 0.000000e+00 : f32
    %50 = vector.shape_cast %49 : vector<1x49xi1> to vector<1x49xi1>
    %51 = vector.broadcast %50 : vector<1x49xi1> to vector<32x49xi1>
    %52 = vector.broadcast %cst_14 : f32 to vector<32x49xf32>
    %53 = arith.select %51, %48, %52 : vector<32x49xi1>, vector<32x49xf32>
    %54 = arith.addf %42, %53 : vector<32x49xf32>
    %55 = vector.extract_strided_slice %44 {offsets = [32, 0], sizes = [32, 49], strides = [1, 1]} : vector<96x49xf32> to vector<32x49xf32>
    %56 = vector.extract_strided_slice %55 {offsets = [0, 42], sizes = [32, 7], strides = [1, 1]} : vector<32x49xf32> to vector<32x7xf32>
    %57 = vector.extract_strided_slice %55 {offsets = [0, 0], sizes = [32, 42], strides = [1, 1]} : vector<32x49xf32> to vector<32x42xf32>
    %58 = tpu.concatenate %56, %57 in 1 : vector<32x7xf32>, vector<32x42xf32> -> vector<32x49xf32>
    %cst_15 = arith.constant 0.000000e+00 : f32
    %59 = vector.shape_cast %15 : vector<1x49xi1> to vector<1x49xi1>
    %60 = vector.broadcast %59 : vector<1x49xi1> to vector<32x49xi1>
    %61 = vector.broadcast %cst_15 : f32 to vector<32x49xf32>
    %62 = arith.select %60, %58, %61 : vector<32x49xi1>, vector<32x49xf32>
    %63 = arith.addf %54, %62 : vector<32x49xf32>
    %64 = vector.extract_strided_slice %44 {offsets = [64, 0], sizes = [32, 49], strides = [1, 1]} : vector<96x49xf32> to vector<32x49xf32>
    %65 = vector.extract_strided_slice %64 {offsets = [0, 43], sizes = [32, 6], strides = [1, 1]} : vector<32x49xf32> to vector<32x6xf32>
    %66 = vector.extract_strided_slice %64 {offsets = [0, 0], sizes = [32, 43], strides = [1, 1]} : vector<32x49xf32> to vector<32x43xf32>
    %67 = tpu.concatenate %65, %66 in 1 : vector<32x6xf32>, vector<32x43xf32> -> vector<32x49xf32>
    %68 = arith.andi %15, %21 : vector<1x49xi1>
    %cst_16 = arith.constant 0.000000e+00 : f32
    %69 = vector.shape_cast %68 : vector<1x49xi1> to vector<1x49xi1>
    %70 = vector.broadcast %69 : vector<1x49xi1> to vector<32x49xi1>
    %71 = vector.broadcast %cst_16 : f32 to vector<32x49xf32>
    %72 = arith.select %70, %67, %71 : vector<32x49xi1>, vector<32x49xf32>
    %73 = arith.addf %63, %72 : vector<32x49xf32>
    %c192 = arith.constant 192 : index
    %c0_17 = arith.constant 0 : index
    %74 = vector.load %arg2[%c192, %c0_17] : memref<288x128xf32, #tpu.memory_space<vmem>>, vector<96x128xf32>
    %cst_18 = arith.constant dense<0.000000e+00> : vector<96x49xf32>
    %75 = tpu.matmul %74, %3, %cst_18 {dimension_numbers = #tpu.dot_dimension_numbers<[1], [0], [0], [1], [0, 0, 1, 1], [], []>} : vector<96x128xf32>, vector<128x49xf32>, vector<96x49xf32> -> vector<96x49xf32>
    %76 = vector.extract_strided_slice %75 {offsets = [0, 0], sizes = [32, 49], strides = [1, 1]} : vector<96x49xf32> to vector<32x49xf32>
    %77 = vector.extract_strided_slice %76 {offsets = [0, 6], sizes = [32, 43], strides = [1, 1]} : vector<32x49xf32> to vector<32x43xf32>
    %78 = vector.extract_strided_slice %76 {offsets = [0, 0], sizes = [32, 6], strides = [1, 1]} : vector<32x49xf32> to vector<32x6xf32>
    %79 = tpu.concatenate %77, %78 in 1 : vector<32x43xf32>, vector<32x6xf32> -> vector<32x49xf32>
    %80 = arith.andi %17, %19 : vector<1x49xi1>
    %cst_19 = arith.constant 0.000000e+00 : f32
    %81 = vector.shape_cast %80 : vector<1x49xi1> to vector<1x49xi1>
    %82 = vector.broadcast %81 : vector<1x49xi1> to vector<32x49xi1>
    %83 = vector.broadcast %cst_19 : f32 to vector<32x49xf32>
    %84 = arith.select %82, %79, %83 : vector<32x49xi1>, vector<32x49xf32>
    %85 = arith.addf %73, %84 : vector<32x49xf32>
    %86 = vector.extract_strided_slice %75 {offsets = [32, 0], sizes = [32, 49], strides = [1, 1]} : vector<96x49xf32> to vector<32x49xf32>
    %87 = vector.extract_strided_slice %86 {offsets = [0, 7], sizes = [32, 42], strides = [1, 1]} : vector<32x49xf32> to vector<32x42xf32>
    %88 = vector.extract_strided_slice %86 {offsets = [0, 0], sizes = [32, 7], strides = [1, 1]} : vector<32x49xf32> to vector<32x7xf32>
    %89 = tpu.concatenate %87, %88 in 1 : vector<32x42xf32>, vector<32x7xf32> -> vector<32x49xf32>
    %cst_20 = arith.constant 0.000000e+00 : f32
    %90 = vector.shape_cast %17 : vector<1x49xi1> to vector<1x49xi1>
    %91 = vector.broadcast %90 : vector<1x49xi1> to vector<32x49xi1>
    %92 = vector.broadcast %cst_20 : f32 to vector<32x49xf32>
    %93 = arith.select %91, %89, %92 : vector<32x49xi1>, vector<32x49xf32>
    %94 = arith.addf %85, %93 : vector<32x49xf32>
    %95 = vector.extract_strided_slice %75 {offsets = [64, 0], sizes = [32, 49], strides = [1, 1]} : vector<96x49xf32> to vector<32x49xf32>
    %96 = vector.extract_strided_slice %95 {offsets = [0, 8], sizes = [32, 41], strides = [1, 1]} : vector<32x49xf32> to vector<32x41xf32>
    %97 = vector.extract_strided_slice %95 {offsets = [0, 0], sizes = [32, 8], strides = [1, 1]} : vector<32x49xf32> to vector<32x8xf32>
    %98 = tpu.concatenate %96, %97 in 1 : vector<32x41xf32>, vector<32x8xf32> -> vector<32x49xf32>
    %99 = arith.andi %17, %21 : vector<1x49xi1>
    %cst_21 = arith.constant 0.000000e+00 : f32
    %100 = vector.shape_cast %99 : vector<1x49xi1> to vector<1x49xi1>
    %101 = vector.broadcast %100 : vector<1x49xi1> to vector<32x49xi1>
    %102 = vector.broadcast %cst_21 : f32 to vector<32x49xf32>
    %103 = arith.select %101, %98, %102 : vector<32x49xi1>, vector<32x49xf32>
    %104 = arith.addf %94, %103 : vector<32x49xf32>
    %c0_22 = arith.constant 0 : index
    %c0_23 = arith.constant 0 : index
    %c0_24 = arith.constant 0 : index
    %105 = vector.load %arg3[%c0_22, %c0_23, %c0_24] : memref<1x32x49xf32, #tpu.memory_space<vmem>>, vector<1x32x49xf32>
    %106 = vector.shape_cast %105 : vector<1x32x49xf32> to vector<32x49xf32>
    %107 = vector.shape_cast %104 : vector<32x49xf32> to vector<1x32x49xf32>
    tpu.vector_store %arg3[%c0_22, %c0_23, %c0_24], %107 {strides = array<i32>} : memref<1x32x49xf32, #tpu.memory_space<vmem>>, vector<1x32x49xf32>,
    return
  }
  func.func @transform_0(%arg0: i32) -> (i32, i32, i32) {
    %c0_i32 = arith.constant 0 : i32
    %c0_i32_0 = arith.constant 0 : i32
    %c0_i32_1 = arith.constant 0 : i32
    return %arg0, %c0_i32, %c0_i32_0 : i32, i32, i32
  }
  func.func @transform_1(%arg0: i32) -> (i32, i32) {
    %c0_i32 = arith.constant 0 : i32
    %c0_i32_0 = arith.constant 0 : i32
    %c0_i32_1 = arith.constant 0 : i32
    return %c0_i32, %c0_i32_0 : i32, i32
  }
  func.func @transform_2(%arg0: i32) -> (i32, i32, i32) {
    %c0_i32 = arith.constant 0 : i32
    %c0_i32_0 = arith.constant 0 : i32
    %c0_i32_1 = arith.constant 0 : i32
    return %arg0, %c0_i32, %c0_i32_0 : i32, i32, i32
  }
}

</mosaic_0001>

<bundles_post_ra>
// kernel: relu_conv2d.1
= control target key start
LH: loop header
LB: loop body
LE: loop exit
PB: predicated region body
PF: predicated region fallthrough
CT: control target
= control target key end

     0   :  { %7 = vsyncpa [#allocation3], 0  ;;  %s1226_s9 = smov [#allocation2]   ;;  %s1589_s0 = inlined_call_operand.vmem [shape: f32[1,128,49], index: 0, kind: input, shape index: {}]   ;;  %s1590_s1 = inlined_call_operand.hbm [shape: f32[288,128], index: 1, kind: input, shape index: {}]   ;;  %s1591_s2 = inlined_call_operand.vmem [shape: f32[1,32,49], index: 2, kind: output, shape index: {}]  }
   0x1   :  { %s15_s10 = sshll.u32 %s1226_s9, 4  ;;  %s1202_s13 = scalar_lea.hbm %s1590_s1, 4608  ;;  %s16_s10 = int_to_ptr.vmem [resolvable:$true] %s15_s10 }
   0x2   :  { %p1203_p0 = scmp.ne.s32.totalorder %s1590_s1, %s1202_s13  ;;  %p1206_p1 = scmp.lt.u32.totalorder %s1202_s13, %s1590_s1 }
   0x4   :  { %p1208_p2 = pnand %p1206_p1, %p1203_p0 }
   0x6   :  { %1211 = shalt.err (!%p1208_p2)
}
   0x7   :  { %s1212_s18 = scalar_lea.vmem %s16_s10, 4608  ;;  %p1217_p4 = scmp.lt.s32.totalorder %s16_s10, %s16_s10 }
   0x8   :  { %p1213_p3 = scmp.ne.s32.totalorder %s16_s10, %s1212_s18  ;;  %p1218_p5 = scmp.lt.s32.totalorder %s1212_s18, %s1212_s18 }
   0xa   :  { %p1219_p6 = por %p1218_p5, %p1217_p4 }
   0xc   :  { %p1220_p7 = pnand %p1219_p6, %p1213_p3 }
   0xe   :  { %1223 = shalt.err (!%p1220_p7)
}
   0xf   :  { %s1227_s19 = smov 128   ;;  %s1228_s20 = smov 8  }
  0x10   :  { %21 = dma.hbm_to_vmem [thread:$0]  %s1590_s1, 4608, %s16_s10, [#allocation3], %s1227_s19, %s1227_s19, %s1228_s20  }
  0x11   :  { %1224 = dma.done.wait [#allocation3], 4608  }
  0x12   :  { %1225 = vsyncadd [#allocation3], 4294962688  ;;  %v25_v0 = vld [vmem:[%s1589_s0] sm:$0xff]  ;;  %v26_v1 = vld [vmem:[%s1589_s0 + $0x8] sm:$0xff]  ;;  %s1230_s27 = smov 80   ;;  %s1231_s28 = smov 87  }
  0x13   :  { %v27_v2 = vld [vmem:[%s1589_s0 + $0x10] sm:$0xff]  ;;  %v41_v3 = vmax.f32 %v25_v0, 0.0  ;;  %v42_v4 = vmax.f32 %v26_v1, 0.0  ;;  %v28_v5 = vld [vmem:[%s1589_s0 + $0x18] sm:$0xff]  ;;  %v29_v7 = vld [vmem:[%s1589_s0 + $0x20] sm:$0xff]  ;;  %s1232_s29 = smov 86  }
  0x14   :  { %v43_v6 = vmax.f32 %v27_v2, 0.0  ;;  %v30_v8 = vld [vmem:[%s1589_s0 + $0x28] sm:$0xff]  ;;  %v44_v9 = vmax.f32 %v28_v5, 0.0  ;;  %v45_v11 = vmax.f32 %v29_v7, 0.0  ;;  %v31_v14 = vld [vmem:[%s1589_s0 + $0x30] sm:$0xff]  ;;  %v32_v15 = vld [vmem:[%s1589_s0 + $0x38] sm:$0xff] }
  0x15   :  { %v1290_v10 = vpack.c.bf16 %v42_v4, %v41_v3  ;;  %v46_v12 = vmax.f32 %v30_v8, 0.0  ;;  %v69_v16 = vld [vmem:[#allocation2 + $0x60] sm:$0xff]  ;;  %v47_v19 = vmax.f32 %v31_v14, 0.0  ;;  %v48_v20 = vmax.f32 %v32_v15, 0.0  ;;  %v34_v22 = vld [vmem:[%s1589_s0 + $0x48] sm:$0xff]  ;;  %v35_v26 = vld [vmem:[%s1589_s0 + $0x50] sm:$0xff] }
  0x16   :  { %v1292_v13 = vpack.c.bf16 %v44_v9, %v43_v6  ;;  %v292_v17 = vld [vmem:[#allocation2] sm:$0xff]  ;;  %954 = vmatprep.mubr.f32.mxu0 %v69_v16  ;;  %v50_v25 = vmax.f32 %v34_v22, 0.0  ;;  %v36_v27 = vld [vmem:[%s1589_s0 + $0x58] sm:$0xff]  ;;  %v51_v29 = vmax.f32 %v35_v26, 0.0  ;;  %v38_v32 = vld [vmem:[%s1589_s0 + $0x68] sm:$0xff]  ;;  %s1233_s30 = smov 7  }
  0x17   :  { %1073 = vmatprep.subr.bf16.mxu0 %v1290_v10  ;;  %1105 = vmatprep.subr.bf16.mxu1 %v1290_v10  ;;  %v1306_v18 = vpack.c.bf16 %v46_v12, %v45_v11  ;;  %v33_v21 = vld [vmem:[%s1589_s0 + $0x40] sm:$0xff]  ;;  %v1318_v23 = vpack.c.bf16 %v48_v20, %v47_v19  ;;  %v52_v30 = vmax.f32 %v36_v27, 0.0  ;;  %v54_v35 = vmax.f32 %v38_v32, 0.0  ;;  %v39_v36 = vld [vmem:[%s1589_s0 + $0x70] sm:$0xff]  ;;  %v40_v37 = vld [vmem:[%s1589_s0 + $0x78] sm:$0xff]  ;;  %s1235_s1 = smov 48  }
  0x18   :  { %1075 = vmatpush3.bf16.msra.mxu0 %v1290_v10  ;;  %1107 = vmatpush3.bf16.msra.mxu1 %v1290_v10  ;;  %v49_v24 = vmax.f32 %v33_v21, 0.0  ;;  %v37_v31 = vld [vmem:[%s1589_s0 + $0x60] sm:$0xff]  ;;  %v55_v39 = vmax.f32 %v39_v36, 0.0  ;;  %v56_v40 = vmax.f32 %v40_v37, 0.0  ;;  %v70_v42 = vld [vmem:[#allocation2 + $0x68] sm:$0xff]  ;;  %v71_v44 = vld [vmem:[#allocation2 + $0x70] sm:$0xff] }
  0x19   :  { %1077 = vmatprep.subr.bf16.mxu0 %v1292_v13  ;;  %1109 = vmatprep.subr.bf16.mxu1 %v1292_v13  ;;  %v1342_v33 = vpack.c.bf16 %v52_v30, %v51_v29  ;;  %v53_v34 = vmax.f32 %v37_v31, 0.0  ;;  %v293_v43 = vld [vmem:[#allocation2 + $0x8] sm:$0xff]  ;;  %v294_v45 = vld [vmem:[#allocation2 + $0x10] sm:$0xff]  ;;  %v72_v46 = vld [vmem:[#allocation2 + $0x78] sm:$0xff]  ;;  %s1229_s0 = smov 1   ;;  %s1236_s3 = smov 85  }
  0x1a   :  { %1004 = vmatprep.mubr.f32.mxu1 %v292_v17  ;;  %v1330_v28 = vpack.c.bf16 %v50_v25, %v49_v24  ;;  %v1360_v41 = vpack.c.bf16 %v56_v40, %v55_v39  ;;  %v295_v47 = vld [vmem:[#allocation2 + $0x18] sm:$0xff]  ;;  %v296_v48 = vld [vmem:[#allocation2 + $0x20] sm:$0xff]  ;;  %v297_v50 = vld [vmem:[#allocation2 + $0x28] sm:$0xff]  ;;  %s1237_s4 = smov 6   ;;  %s1238_s5 = smov 122   ;;  %vm234_vm0 = vcmask 7168  }
  0x1b   :  { %v1354_v38 = vpack.c.bf16 %v54_v35, %v53_v34  ;;  %v73_v49 = vld [vmem:[#allocation2 + $0x80] sm:$0xff]  ;;  %v74_v51 = vld [vmem:[#allocation2 + $0x88] sm:$0xff]  ;;  %v298_v52 = vld [vmem:[#allocation2 + $0x30] sm:$0xff]  ;;  %s1239_s6 = smov 43   ;;  %s1240_s7 = smov 121   ;;  %vm457_vm2 = vcmask 64512  }
  0x1c   :  { %1079 = vmatpush3.bf16.msra.mxu0 %v1292_v13  ;;  %1111 = vmatpush3.bf16.msra.mxu1 %v1292_v13  ;;  %v75_v53 = vld [vmem:[#allocation2 + $0x90] sm:$0xff]  ;;  %v299_v54 = vld [vmem:[#allocation2 + $0x38] sm:$0xff]  ;;  %v77_v56 = vld [vmem:[#allocation2 + $0xa0] sm:$0xff]  ;;  %s1241_s8 = smov 42   ;;  %s1242_s9 = smov 120   ;;  %vm501_vm3 = vcmask 56320  }
  0x1d   :  { %1081 = vmatprep.subr.bf16.mxu0 %v1306_v18  ;;  %1113 = vmatprep.subr.bf16.mxu1 %v1306_v18  ;;  %v76_v55 = vld [vmem:[#allocation2 + $0x98] sm:$0xff]  ;;  %v300_v57 = vld [vmem:[#allocation2 + $0x40] sm:$0xff]  ;;  %v78_v58 = vld [vmem:[#allocation2 + $0xa8] sm:$0xff]  ;;  %s1243_s10 = smov 41   ;;  %vm277_vm5 = vcmask 392192   ;;  %vm544_vm8 = vcmask 48128  }
  0x1e   :  { %v301_v59 = vld [vmem:[#allocation2 + $0x48] sm:$0xff]  ;;  %v79_v60 = vld [vmem:[#allocation2 + $0xb0] sm:$0xff]  ;;  %v80_v62 = vld [vmem:[#allocation2 + $0xb8] sm:$0xff]  ;;  %vm725_vm10 = vcmask 351232   ;;  %vm812_vm13 = vcmask 334848   ;;  %vm769_vm14 = vcmask 343040  }
  0x1f   :  { %v302_v61 = vld [vmem:[#allocation2 + $0x50] sm:$0xff]  ;;  %v303_v63 = vld [vmem:[#allocation2 + $0x58] sm:$0xff]  ;;  %v560_v0 = vld [vmem:[#allocation2 + $0xc0] sm:$0xff]  ;;  %vm828_vm15 = vcmask 400384  }
  0x20   :  { %1083 = vmatpush3.bf16.msra.mxu0 %v1306_v18  ;;  %1115 = vmatpush3.bf16.msra.mxu1 %v1306_v18  ;;  %v566_v1 = vld [vmem:[#allocation2 + $0xf0] sm:$0xff]  ;;  %v561_v2 = vld [vmem:[#allocation2 + $0xc8] sm:$0xff]  ;;  %v567_v3 = vld [vmem:[#allocation2 + $0xf8] sm:$0xff] }
  0x21   :  { %1085 = vmatprep.subr.bf16.mxu0 %v1318_v23  ;;  %1117 = vmatprep.subr.bf16.mxu1 %v1318_v23  ;;  %v562_v4 = vld [vmem:[#allocation2 + $0xd0] sm:$0xff]  ;;  %v568_v5 = vld [vmem:[#allocation2 + $0x100] sm:$0xff]  ;;  %v563_v6 = vld [vmem:[#allocation2 + $0xd8] sm:$0xff] }
  0x22   :  { %v569_v7 = vld [vmem:[#allocation2 + $0x108] sm:$0xff]  ;;  %v564_v8 = vld [vmem:[#allocation2 + $0xe0] sm:$0xff]  ;;  %v570_v9 = vld [vmem:[#allocation2 + $0x110] sm:$0xff] }
  0x23   :  { %v571_v11 = vld [vmem:[#allocation2 + $0x118] sm:$0xff] }
  0x24   :  { %1087 = vmatpush3.bf16.msra.mxu0 %v1318_v23  ;;  %1119 = vmatpush3.bf16.msra.mxu1 %v1318_v23 }
  0x25   :  { %1089 = vmatprep.subr.bf16.mxu0 %v1330_v28  ;;  %1121 = vmatprep.subr.bf16.mxu1 %v1330_v28 }
  0x28   :  { %1091 = vmatpush3.bf16.msra.mxu0 %v1330_v28  ;;  %1123 = vmatpush3.bf16.msra.mxu1 %v1330_v28 }
  0x29   :  { %1093 = vmatprep.subr.bf16.mxu0 %v1342_v33  ;;  %1125 = vmatprep.subr.bf16.mxu1 %v1342_v33 }
  0x2c   :  { %1095 = vmatpush3.bf16.msra.mxu0 %v1342_v33  ;;  %1127 = vmatpush3.bf16.msra.mxu1 %v1342_v33 }
  0x2d   :  { %1097 = vmatprep.subr.bf16.mxu0 %v1354_v38  ;;  %1129 = vmatprep.subr.bf16.mxu1 %v1354_v38 }
  0x30   :  { %1099 = vmatpush3.bf16.msra.mxu0 %v1354_v38  ;;  %1131 = vmatpush3.bf16.msra.mxu1 %v1354_v38 }
  0x31   :  { %1101 = vmatprep.subr.bf16.mxu0 %v1360_v41  ;;  %1133 = vmatprep.subr.bf16.mxu1 %v1360_v41 }
  0x34   :  { %1103 = vmatpush3.bf16.msra.mxu0 %v1360_v41  ;;  %1135 = vmatpush3.bf16.msra.mxu1 %v1360_v41 }
  0x35   :  { %1137 = vmatprep.subr.bf16.mxu0 %v1290_v10  ;;  %1168 = vmatprep.subr.bf16.mxu1 %v1290_v10 }
  0x37   :  { %955 = vmatmul.mubr.f32.vlgmr.msra.gmra.mrb[0].mxu0 %v70_v42  ;;  %1005 = vmatmul.mubr.f32.vlgmr.msra.gmra.mrb[0].mxu1 %v293_v43 }
  0x38   :  { %957 = vmatprep.mubr.f32.mxu0 %v71_v44  ;;  %1007 = vmatprep.mubr.f32.mxu1 %v294_v45 }
  0x39   :  { %1139 = vmatpush3.bf16.msra.mxu0 %v1290_v10  ;;  %1176 = vmatpush3.bf16.msra.mxu1 %v1290_v10  ;;  %v565_v10 = vld [vmem:[#allocation2 + $0xe8] sm:$0xff] }
  0x3a   :  { %1141 = vmatprep.subr.bf16.mxu0 %v1292_v13  ;;  %1169 = vmatprep.subr.bf16.mxu1 %v1292_v13 }
  0x3b   :  { %958 = vmatmul.mubr.f32.gmra.mrb[2].mxu0 %v72_v46  ;;  %1008 = vmatmul.mubr.f32.gmra.mrb[2].mxu1 %v295_v47 }
  0x3c   :  { %1010 = vmatprep.mubr.f32.mxu1 %v296_v48  ;;  %960 = vmatprep.mubr.f32.mxu0 %v73_v49  ;;  %v57_v48 = vlaneseq }
  0x3d   :  { %1143 = vmatpush3.bf16.msra.mxu0 %v1292_v13  ;;  %1177 = vmatpush3.bf16.msra.mxu1 %v1292_v13 }
  0x3e   :  { %1145 = vmatprep.subr.bf16.mxu0 %v1306_v18  ;;  %1170 = vmatprep.subr.bf16.mxu1 %v1306_v18  ;;  %v1430_v49 = vand.u32 127, %v57_v48 }
  0x3f   :  { %1011 = vmatmul.mubr.f32.gmra.mrb[4].mxu1 %v297_v50  ;;  %961 = vmatmul.mubr.f32.gmra.mrb[4].mxu0 %v74_v51 }
  0x40   :  { %1013 = vmatprep.mubr.f32.mxu1 %v298_v52  ;;  %963 = vmatprep.mubr.f32.mxu0 %v75_v53  ;;  %v59_v50 = vcvt.s32.f32 %v1430_v49  ;;  %vm65_vm4 = vcmp.ge.s32.totalorder %v1430_v49, 7  ;;  %vm66_vm9 = vcmp.lt.s32.totalorder %v1430_v49, 42 }
  0x41   :  { %1147 = vmatpush3.bf16.msra.mxu0 %v1306_v18  ;;  %1178 = vmatpush3.bf16.msra.mxu1 %v1306_v18 }
  0x42   :  { %1149 = vmatprep.subr.bf16.mxu0 %v1318_v23  ;;  %1171 = vmatprep.subr.bf16.mxu1 %v1318_v23  ;;  %v60_v51 = vadd.f32 0.5, %v59_v50 }
  0x43   :  { %1014 = vmatmul.mubr.f32.gmra.mrb[6].mxu1 %v299_v54  ;;  %964 = vmatmul.mubr.f32.gmra.mrb[6].mxu0 %v76_v55 }
  0x44   :  { %966 = vmatprep.mubr.f32.mxu0 %v77_v56  ;;  %1016 = vmatprep.mubr.f32.mxu1 %v300_v57  ;;  %v61_v52 = vmul.f32 0.14285715, %v60_v51 }
  0x45   :  { %1151 = vmatpush3.bf16.msra.mxu0 %v1318_v23  ;;  %1179 = vmatpush3.bf16.msra.mxu1 %v1318_v23 }
  0x46   :  { %1153 = vmatprep.subr.bf16.mxu0 %v1330_v28  ;;  %1172 = vmatprep.subr.bf16.mxu1 %v1330_v28  ;;  %v62_v53 = vfloor.f32 %v61_v52 }
  0x47   :  { %967 = vmatmul.mubr.f32.gmra.mrb[8].mxu0 %v78_v58  ;;  %1017 = vmatmul.mubr.f32.gmra.mrb[8].mxu1 %v301_v59 }
  0x48   :  { %969 = vmatprep.mubr.f32.mxu0 %v79_v60  ;;  %1019 = vmatprep.mubr.f32.mxu1 %v302_v61  ;;  %v63_v54 = vmul.f32 7.0, %v62_v53 }
  0x49   :  { %1155 = vmatpush3.bf16.msra.mxu0 %v1330_v28  ;;  %1180 = vmatpush3.bf16.msra.mxu1 %v1330_v28 }
  0x4a   :  { %1157 = vmatprep.subr.bf16.mxu0 %v1342_v33  ;;  %1173 = vmatprep.subr.bf16.mxu1 %v1342_v33  ;;  %v1433_v55 = vsub.f32 %v59_v50, %v63_v54 }
  0x4b   :  { %970 = vmatmul.mubr.f32.gmra.mrb[10].mxu0 %v80_v62  ;;  %1020 = vmatmul.mubr.f32.gmra.mrb[10].mxu1 %v303_v63 }
  0x4c   :  { %1054 = vmatprep.mubr.f32.mxu0 %v560_v0  ;;  %1063 = vmatprep.mubr.f32.mxu1 %v566_v1  ;;  %vm67_vm1 = vcmp.ge.f32.partialorder %v1433_v55, 0.5  ;;  %vm68_vm6 = vcmp.le.f32.partialorder %v1433_v55, 5.5 }
  0x4d   :  { %1159 = vmatpush3.bf16.msra.mxu0 %v1342_v33  ;;  %1181 = vmatpush3.bf16.msra.mxu1 %v1342_v33  ;;  %vm1468_vm7 = vmand %vm65_vm4, %vm67_vm1 }
  0x4e   :  { %1161 = vmatprep.subr.bf16.mxu0 %v1354_v38  ;;  %1174 = vmatprep.subr.bf16.mxu1 %v1354_v38  ;;  %vm1505_vm11 = vmand %vm65_vm4, %vm68_vm6 }
  0x4f   :  { %vm1515_vm12 = vmand %vm66_vm9, %vm67_vm1 }
  0x51   :  { %1163 = vmatpush3.bf16.msra.mxu0 %v1354_v38  ;;  %1182 = vmatpush3.bf16.msra.mxu1 %v1354_v38 }
  0x52   :  { %1165 = vmatprep.subr.bf16.mxu0 %v1360_v41  ;;  %1175 = vmatprep.subr.bf16.mxu1 %v1360_v41 }
  0x55   :  { %1167 = vmatpush3.bf16.msra.mxu0 %v1360_v41  ;;  %1183 = vmatpush3.bf16.msra.mxu1 %v1360_v41 }
  0x58   :  { %1055 = vmatmul.mubr.f32.vlgmr.msra.gmra.mrb[12].mxu0 %v561_v2  ;;  %1064 = vmatmul.mubr.f32.vlgmr.msra.gmra.mrb[12].mxu1 %v567_v3 }
  0x59   :  { %1057 = vmatprep.mubr.f32.mxu0 %v562_v4  ;;  %1066 = vmatprep.mubr.f32.mxu1 %v568_v5 }
  0x5c   :  { %1058 = vmatmul.mubr.f32.gmra.mrb[14].mxu0 %v563_v6  ;;  %1067 = vmatmul.mubr.f32.gmra.mrb[14].mxu1 %v569_v7 }
  0x5d   :  { %1060 = vmatprep.mubr.f32.mxu0 %v564_v8  ;;  %1069 = vmatprep.mubr.f32.mxu1 %v570_v9 }
  0x60   :  { %1061 = vmatmul.mubr.f32.gmra.mrb[16].mxu0 %v565_v10  ;;  %1070 = vmatmul.mubr.f32.gmra.mrb[16].mxu1 %v571_v11 }
 0x10a   :  { %v956_v12 = vpop.f32.mrb[0].mxu0  ;;  %v1006_v13 = vpop.f32.mrb[0].mxu1 }
 0x10b   :  { %224 = vrot.lane.b32.xlu1 %v956_v12, %s1229_s0  ;;  %212 = vrot.lane.b32.xlu0 %v956_v12, %s1230_s27  ;;  %v147_v14 = vpop.f32.mrb[1].mxu0  ;;  %v370_v15 = vpop.f32.mrb[1].mxu1 }
 0x10e   :  { %v959_v16 = vpop.f32.mrb[2].mxu0  ;;  %v1009_v17 = vpop.f32.mrb[2].mxu1 }
 0x10f   :  { %435 = vrot.lane.b32.xlu1 %v1006_v13, %s1231_s28  ;;  %210 = vrot.lane.b32.xlu0 %v147_v14, %s1230_s27  ;;  %v157_v18 = vpop.f32.mrb[3].mxu0  ;;  %v380_v19 = vpop.f32.mrb[3].mxu1 }
 0x112   :  { %v1012_v20 = vpop.f32.mrb[4].mxu1  ;;  %v1404_v21 = vpop.f32.mrb[4].mxu0 }
 0x113   :  { %447 = vrot.lane.b32.xlu1 %v1006_v13, %s1228_s20  ;;  %222 = vrot.lane.b32.xlu0 %v147_v14, %s1229_s0  ;;  %v390_v22 = vpop.f32.mrb[5].mxu1  ;;  %v1408_v23 = vpop.f32.mrb[5].mxu0 }
 0x116   :  { %v1015_v24 = vpop.f32.mrb[6].mxu1  ;;  %v1410_v25 = vpop.f32.mrb[6].mxu0 }
 0x117   :  { %433 = vrot.lane.b32.xlu0 %v370_v15, %s1231_s28  ;;  %216 = vrot.lane.b32.xlu1 %v959_v16, %s1230_s27  ;;  %v400_v26 = vpop.f32.mrb[7].mxu1  ;;  %v1414_v27 = vpop.f32.mrb[7].mxu0 }
 0x11a   :  { %v968_v28 = vpop.f32.mrb[8].mxu0  ;;  %v1018_v29 = vpop.f32.mrb[8].mxu1 }
 0x11b   :  { %445 = vrot.lane.b32.xlu0 %v370_v15, %s1228_s20  ;;  %228 = vrot.lane.b32.xlu1 %v959_v16, %s1229_s0  ;;  %v187_v30 = vpop.f32.mrb[9].mxu0  ;;  %v410_v31 = vpop.f32.mrb[9].mxu1 }
 0x11e   :  { %v971_v32 = vpop.f32.mrb[10].mxu0  ;;  %v1021_v33 = vpop.f32.mrb[10].mxu1 }
 0x11f   :  { %439 = vrot.lane.b32.xlu1 %v1009_v17, %s1231_s28  ;;  %226 = vrot.lane.b32.xlu0 %v157_v18, %s1229_s0  ;;  %v197_v34 = vpop.f32.mrb[11].mxu0  ;;  %v420_v35 = vpop.f32.mrb[11].mxu1 }
 0x123   :  { %451 = vrot.lane.b32.xlu1 %v1009_v17, %s1228_s20  ;;  %437 = vrot.lane.b32.xlu0 %v380_v19, %s1231_s28 }
 0x127   :  { %449 = vrot.lane.b32.xlu0 %v380_v19, %s1228_s20  ;;  %214 = vrot.lane.b32.xlu1 %v157_v18, %s1230_s27  ;;  %s1234_s20 = smov 127  }
 0x12b   :  { %477 = vrot.lane.b32.xlu0 %v390_v22, %s1232_s29  ;;  %479 = vrot.lane.b32.xlu1 %v1012_v20, %s1232_s29  ;;  %v1056_v36 = vpop.f32.mrb[12].mxu0  ;;  %v1065_v37 = vpop.f32.mrb[12].mxu1 }
 0x12c   :  { %v638_v38 = vpop.f32.mrb[13].mxu0  ;;  %v668_v39 = vpop.f32.mrb[13].mxu1 }
 0x12f   :  { %489 = vrot.lane.b32.xlu0 %v390_v22, %s1233_s30  ;;  %491 = vrot.lane.b32.xlu1 %v1012_v20, %s1233_s30  ;;  %v1059_v40 = vpop.f32.mrb[14].mxu0  ;;  %v1068_v41 = vpop.f32.mrb[14].mxu1 }
 0x130   :  { %v648_v42 = vpop.f32.mrb[15].mxu0  ;;  %v678_v43 = vpop.f32.mrb[15].mxu1 }
 0x133   :  { %481 = vrot.lane.b32.xlu0 %v400_v26, %s1232_s29  ;;  %483 = vrot.lane.b32.xlu1 %v1015_v24, %s1232_s29  ;;  %v1424_v44 = vpop.f32.mrb[16].mxu0  ;;  %v1426_v45 = vpop.f32.mrb[16].mxu1 }
 0x134   :  { %v658_v46 = vpop.f32.mrb[17].mxu0  ;;  %v1428_v47 = vpop.f32.mrb[17].mxu1 }
 0x137   :  { %493 = vrot.lane.b32.xlu0 %v400_v26, %s1233_s30  ;;  %495 = vrot.lane.b32.xlu1 %v1015_v24, %s1233_s30 }
 0x13b   :  { %255 = vrot.lane.b32.xlu1 %v968_v28, %s1234_s20  ;;  %253 = vrot.lane.b32.xlu0 %v187_v30, %s1234_s20 }
 0x13f   :  { %267 = vrot.lane.b32.xlu1 %v968_v28, %s1235_s1  ;;  %265 = vrot.lane.b32.xlu0 %v187_v30, %s1235_s1 }
 0x143   :  { %522 = vrot.lane.b32.xlu1 %v1018_v29, %s1236_s3  ;;  %520 = vrot.lane.b32.xlu0 %v410_v31, %s1236_s3 }
 0x147   :  { %534 = vrot.lane.b32.xlu1 %v1018_v29, %s1237_s4  ;;  %532 = vrot.lane.b32.xlu0 %v410_v31, %s1237_s4 }
 0x14b   :  { %259 = vrot.lane.b32.xlu1 %v971_v32, %s1234_s20  ;;  %257 = vrot.lane.b32.xlu0 %v197_v34, %s1234_s20 }
 0x14f   :  { %271 = vrot.lane.b32.xlu1 %v971_v32, %s1235_s1  ;;  %269 = vrot.lane.b32.xlu0 %v197_v34, %s1235_s1 }
 0x153   :  { %526 = vrot.lane.b32.xlu1 %v1021_v33, %s1236_s3  ;;  %524 = vrot.lane.b32.xlu0 %v420_v35, %s1236_s3 }
 0x157   :  { %538 = vrot.lane.b32.xlu1 %v1021_v33, %s1237_s4  ;;  %536 = vrot.lane.b32.xlu0 %v420_v35, %s1237_s4 }
 0x15b   :  { %703 = vrot.lane.b32.xlu1 %v1056_v36, %s1238_s5  ;;  %701 = vrot.lane.b32.xlu0 %v638_v38, %s1238_s5 }
 0x15f   :  { %715 = vrot.lane.b32.xlu1 %v1056_v36, %s1239_s6  ;;  %713 = vrot.lane.b32.xlu0 %v638_v38, %s1239_s6 }
 0x163   :  { %751 = vrot.lane.b32.xlu1 %v1065_v37, %s1240_s7  ;;  %749 = vrot.lane.b32.xlu0 %v668_v39, %s1240_s7 }
 0x167   :  { %763 = vrot.lane.b32.xlu1 %v1065_v37, %s1241_s8  ;;  %761 = vrot.lane.b32.xlu0 %v668_v39, %s1241_s8 }
 0x16b   :  { %707 = vrot.lane.b32.xlu1 %v1059_v40, %s1238_s5  ;;  %705 = vrot.lane.b32.xlu0 %v648_v42, %s1238_s5 }
 0x16f   :  { %719 = vrot.lane.b32.xlu1 %v1059_v40, %s1239_s6  ;;  %717 = vrot.lane.b32.xlu0 %v648_v42, %s1239_s6 }
 0x173   :  { %790 = vrot.lane.b32.xlu1 %v1068_v41, %s1242_s9  ;;  %788 = vrot.lane.b32.xlu0 %v678_v43, %s1242_s9 }
 0x177   :  { %802 = vrot.lane.b32.xlu1 %v1068_v41, %s1243_s10  ;;  %800 = vrot.lane.b32.xlu0 %v678_v43, %s1243_s10 }
 0x17b   :  { %747 = vrot.lane.b32.xlu1 %v1424_v44, %s1240_s7  ;;  %745 = vrot.lane.b32.xlu0 %v658_v46, %s1240_s7 }
 0x17d   :  { %v225_v56 = vpop.permute.xlu1 %224  ;;  %v213_v57 = vpop.permute.xlu0 %212 }
 0x17e   :  { %v236_v58 = vsel %vm234_vm0, %v213_v57, %v225_v56 }
 0x17f   :  { %v242_v59 = vsel %vm67_vm1, %v236_v58, 0.0  ;;  %759 = vrot.lane.b32.xlu1 %v1424_v44, %s1241_s8  ;;  %757 = vrot.lane.b32.xlu0 %v658_v46, %s1241_s8 }
 0x180   :  { %v246_v60 = vadd.f32 %v1404_v21, %v242_v59 }
 0x181   :  { %v436_v61 = vpop.permute.xlu1 %435  ;;  %v211_v62 = vpop.permute.xlu0 %210 }
 0x183   :  { %794 = vrot.lane.b32.xlu1 %v1426_v45, %s1242_s9  ;;  %792 = vrot.lane.b32.xlu0 %v1428_v47, %s1242_s9 }
 0x185   :  { %v448_v63 = vpop.permute.xlu1 %447  ;;  %v223_v0 = vpop.permute.xlu0 %222 }
 0x186   :  { %v459_v1 = vsel %vm457_vm2, %v436_v61, %v448_v63  ;;  %v235_v2 = vsel %vm234_vm0, %v211_v62, %v223_v0 }
 0x187   :  { %v241_v3 = vsel %vm67_vm1, %v235_v2, 0.0  ;;  %806 = vrot.lane.b32.xlu1 %v1426_v45, %s1243_s10  ;;  %804 = vrot.lane.b32.xlu0 %v1428_v47, %s1243_s10  ;;  %v466_v47 = vsel %vm1468_vm7, %v459_v1, 0.0 }
 0x188   :  { %v245_v4 = vadd.f32 %v241_v3, %v1408_v23 }
 0x189   :  { %v434_v5 = vpop.permute.xlu0 %433  ;;  %v217_v6 = vpop.permute.xlu1 %216 }
 0x18d   :  { %v446_v7 = vpop.permute.xlu0 %445  ;;  %v229_v8 = vpop.permute.xlu1 %228 }
 0x18e   :  { %v458_v9 = vsel %vm457_vm2, %v434_v5, %v446_v7  ;;  %v238_v10 = vsel %vm234_vm0, %v217_v6, %v229_v8 }
 0x18f   :  { %v244_v11 = vsel %vm67_vm1, %v238_v10, 0.0  ;;  %v465_v48 = vsel %vm1468_vm7, %v458_v9, 0.0 }
 0x190   :  { %v248_v12 = vadd.f32 %v1410_v25, %v244_v11 }
 0x191   :  { %v440_v13 = vpop.permute.xlu1 %439  ;;  %v227_v14 = vpop.permute.xlu0 %226 }
 0x195   :  { %v452_v15 = vpop.permute.xlu1 %451  ;;  %v438_v16 = vpop.permute.xlu0 %437 }
 0x196   :  { %v461_v17 = vsel %vm457_vm2, %v440_v13, %v452_v15 }
 0x197   :  { %v468_v7 = vsel %vm1468_vm7, %v461_v17, 0.0 }
 0x199   :  { %v450_v18 = vpop.permute.xlu0 %449  ;;  %v215_v19 = vpop.permute.xlu1 %214 }
 0x19a   :  { %v460_v20 = vsel %vm457_vm2, %v438_v16, %v450_v18  ;;  %v237_v21 = vsel %vm234_vm0, %v215_v19, %v227_v14  ;;  %vm1541_vm0 = vmand %vm66_vm9, %vm68_vm6 }
 0x19b   :  { %v243_v22 = vsel %vm67_vm1, %v237_v21, 0.0  ;;  %v467_v8 = vsel %vm1468_vm7, %v460_v20, 0.0 }
 0x19c   :  { %v247_v23 = vadd.f32 %v243_v22, %v1414_v27 }
 0x19d   :  { %v478_v24 = vpop.permute.xlu0 %477  ;;  %v480_v26 = vpop.permute.xlu1 %479 }
 0x1a1   :  { %v490_v25 = vpop.permute.xlu0 %489  ;;  %v492_v28 = vpop.permute.xlu1 %491 }
 0x1a2   :  { %v502_v29 = vsel %vm501_vm3, %v478_v24, %v490_v25  ;;  %v503_v30 = vsel %vm501_vm3, %v480_v26, %v492_v28 }
 0x1a3   :  { %v508_v54 = vsel %vm65_vm4, %v502_v29, 0.0  ;;  %v509_v56 = vsel %vm65_vm4, %v503_v30, 0.0 }
 0x1a5   :  { %v482_v31 = vpop.permute.xlu0 %481  ;;  %v484_v32 = vpop.permute.xlu1 %483 }
 0x1a9   :  { %v494_v33 = vpop.permute.xlu0 %493  ;;  %v496_v34 = vpop.permute.xlu1 %495 }
 0x1aa   :  { %v504_v35 = vsel %vm501_vm3, %v482_v31, %v494_v33  ;;  %v505_v36 = vsel %vm501_vm3, %v484_v32, %v496_v34 }
 0x1ab   :  { %v510_v14 = vsel %vm65_vm4, %v504_v35, 0.0  ;;  %v511_v15 = vsel %vm65_vm4, %v505_v36, 0.0 }
 0x1ad   :  { %v256_v37 = vpop.permute.xlu1 %255  ;;  %v254_v38 = vpop.permute.xlu0 %253 }
 0x1b1   :  { %v268_v27 = vpop.permute.xlu1 %267  ;;  %v266_v39 = vpop.permute.xlu0 %265 }
 0x1b2   :  { %v279_v41 = vsel %vm277_vm5, %v256_v37, %v268_v27  ;;  %v278_v42 = vsel %vm277_vm5, %v254_v38, %v266_v39 }
 0x1b3   :  { %v285_v43 = vsel %vm68_vm6, %v279_v41, 0.0  ;;  %v284_v44 = vsel %vm68_vm6, %v278_v42, 0.0 }
 0x1b4   :  { %v289_v45 = vadd.f32 %v285_v43, %v246_v60  ;;  %v288_v46 = vadd.f32 %v284_v44, %v245_v4 }
 0x1b5   :  { %v523_v50 = vpop.permute.xlu1 %522  ;;  %v521_v51 = vpop.permute.xlu0 %520 }
 0x1b6   :  { %v470_v52 = vadd.f32 %v466_v47, %v289_v45  ;;  %v469_v53 = vadd.f32 %v465_v48, %v288_v46 }
 0x1b8   :  { %v513_v57 = vadd.f32 %v509_v56, %v470_v52  ;;  %v512_v58 = vadd.f32 %v508_v54, %v469_v53 }
 0x1b9   :  { %v535_v59 = vpop.permute.xlu1 %534  ;;  %v533_v60 = vpop.permute.xlu0 %532 }
 0x1ba   :  { %v546_v35 = vsel %vm544_vm8, %v523_v50, %v535_v59  ;;  %v545_v36 = vsel %vm544_vm8, %v521_v51, %v533_v60 }
 0x1bb   :  { %v553_v41 = vsel %vm1505_vm11, %v546_v35, 0.0  ;;  %v552_v42 = vsel %vm1505_vm11, %v545_v36, 0.0 }
 0x1bc   :  { %v557_v50 = vadd.f32 %v553_v41, %v513_v57  ;;  %v556_v51 = vadd.f32 %v552_v42, %v512_v58 }
 0x1bd   :  { %v260_v61 = vpop.permute.xlu1 %259  ;;  %v258_v62 = vpop.permute.xlu0 %257 }
 0x1c1   :  { %v272_v63 = vpop.permute.xlu1 %271  ;;  %v270_v0 = vpop.permute.xlu0 %269 }
 0x1c2   :  { %v281_v1 = vsel %vm277_vm5, %v260_v61, %v272_v63  ;;  %v280_v2 = vsel %vm277_vm5, %v258_v62, %v270_v0 }
 0x1c3   :  { %v287_v3 = vsel %vm68_vm6, %v281_v1, 0.0  ;;  %v286_v4 = vsel %vm68_vm6, %v280_v2, 0.0 }
 0x1c4   :  { %v291_v5 = vadd.f32 %v287_v3, %v248_v12  ;;  %v290_v6 = vadd.f32 %v286_v4, %v247_v23 }
 0x1c5   :  { %v527_v9 = vpop.permute.xlu1 %526  ;;  %v525_v10 = vpop.permute.xlu0 %524 }
 0x1c6   :  { %v472_v11 = vadd.f32 %v468_v7, %v291_v5  ;;  %v471_v13 = vadd.f32 %v467_v8, %v290_v6 }
 0x1c8   :  { %v515_v16 = vadd.f32 %v511_v15, %v472_v11  ;;  %v514_v18 = vadd.f32 %v510_v14, %v471_v13 }
 0x1c9   :  { %v539_v12 = vpop.permute.xlu1 %538  ;;  %v537_v19 = vpop.permute.xlu0 %536 }
 0x1ca   :  { %v548_v45 = vsel %vm544_vm8, %v527_v9, %v539_v12  ;;  %v547_v46 = vsel %vm544_vm8, %v525_v10, %v537_v19 }
 0x1cb   :  { %v555_v54 = vsel %vm1505_vm11, %v548_v45, 0.0  ;;  %v554_v56 = vsel %vm1505_vm11, %v547_v46, 0.0 }
 0x1cc   :  { %v559_v5 = vadd.f32 %v555_v54, %v515_v16  ;;  %v558_v6 = vadd.f32 %v554_v56, %v514_v18 }
 0x1cd   :  { %v704_v21 = vpop.permute.xlu1 %703  ;;  %v702_v22 = vpop.permute.xlu0 %701 }
 0x1d1   :  { %v716_v17 = vpop.permute.xlu1 %715  ;;  %v714_v23 = vpop.permute.xlu0 %713 }
 0x1d2   :  { %v727_v39 = vsel %vm725_vm10, %v704_v21, %v716_v17  ;;  %v726_v40 = vsel %vm725_vm10, %v702_v22, %v714_v23 }
 0x1d3   :  { %v734_v47 = vsel %vm1515_vm12, %v727_v39, 0.0  ;;  %v733_v48 = vsel %vm1515_vm12, %v726_v40, 0.0 }
 0x1d4   :  { %v738_v59 = vadd.f32 %v734_v47, %v557_v50  ;;  %v737_v60 = vadd.f32 %v733_v48, %v556_v51 }
 0x1d5   :  { %v752_v24 = vpop.permute.xlu1 %751  ;;  %v750_v20 = vpop.permute.xlu0 %749 }
 0x1d9   :  { %v764_v26 = vpop.permute.xlu1 %763  ;;  %v762_v25 = vpop.permute.xlu0 %761 }
 0x1da   :  { %v773_v9 = vsel %vm769_vm14, %v752_v24, %v764_v26  ;;  %v772_v10 = vsel %vm769_vm14, %v750_v20, %v762_v25 }
 0x1db   :  { %v779_v16 = vsel %vm66_vm9, %v773_v9, 0.0  ;;  %v778_v18 = vsel %vm66_vm9, %v772_v10, 0.0 }
 0x1dd   :  { %v708_v28 = vpop.permute.xlu1 %707  ;;  %v706_v29 = vpop.permute.xlu0 %705 }
 0x1e1   :  { %v720_v30 = vpop.permute.xlu1 %719  ;;  %v718_v31 = vpop.permute.xlu0 %717 }
 0x1e2   :  { %v729_v52 = vsel %vm725_vm10, %v708_v28, %v720_v30  ;;  %v728_v53 = vsel %vm725_vm10, %v706_v29, %v718_v31 }
 0x1e3   :  { %v736_v2 = vsel %vm1515_vm12, %v729_v52, 0.0  ;;  %v735_v55 = vsel %vm1515_vm12, %v728_v53, 0.0 }
 0x1e4   :  { %v740_v12 = vadd.f32 %v736_v2, %v559_v5  ;;  %v739_v19 = vadd.f32 %v735_v55, %v558_v6 }
 0x1e5   :  { %v791_v32 = vpop.permute.xlu1 %790  ;;  %v789_v33 = vpop.permute.xlu0 %788 }
 0x1e6   :  { %v783_v24 = vadd.f32 %v779_v16, %v740_v12  ;;  %v782_v26 = vadd.f32 %v778_v18, %v739_v19 }
 0x1e9   :  { %v803_v37 = vpop.permute.xlu1 %802  ;;  %v801_v38 = vpop.permute.xlu0 %800 }
 0x1ea   :  { %v814_v58 = vsel %vm812_vm13, %v791_v32, %v803_v37  ;;  %v813_v63 = vsel %vm812_vm13, %v789_v33, %v801_v38 }
 0x1eb   :  { %v821_v11 = vsel %vm1541_vm0, %v814_v58, 0.0  ;;  %v820_v13 = vsel %vm1541_vm0, %v813_v63, 0.0 }
 0x1ed   :  { %v748_v43 = vpop.permute.xlu1 %747  ;;  %v746_v44 = vpop.permute.xlu0 %745 }
 0x1f1   :  { %v760_v61 = vpop.permute.xlu1 %759  ;;  %v758_v62 = vpop.permute.xlu0 %757 }
 0x1f2   :  { %v771_v0 = vsel %vm769_vm14, %v748_v43, %v760_v61  ;;  %v770_v1 = vsel %vm769_vm14, %v746_v44, %v758_v62 }
 0x1f3   :  { %v777_v3 = vsel %vm66_vm9, %v771_v0, 0.0  ;;  %v776_v4 = vsel %vm66_vm9, %v770_v1, 0.0 }
 0x1f4   :  { %v781_v7 = vadd.f32 %v777_v3, %v738_v59  ;;  %v780_v8 = vadd.f32 %v776_v4, %v737_v60 }
 0x1f5   :  { %v795_v14 = vpop.permute.xlu1 %794  ;;  %v793_v15 = vpop.permute.xlu0 %792 }
 0x1f6   :  { %v825_v21 = vadd.f32 %v821_v11, %v781_v7  ;;  %v824_v22 = vadd.f32 %v820_v13, %v780_v8 }
 0x1f8   :  { %830 = vst.msk [vmem:[%s1591_s2 + $0x8] sm:$0xff] %vm828_vm15, %v825_v21  ;;  %829 = vst.msk [vmem:[%s1591_s2] sm:$0xff] %vm828_vm15, %v824_v22 }
 0x1f9   :  { %v807_v17 = vpop.permute.xlu1 %806  ;;  %v805_v23 = vpop.permute.xlu0 %804 }
 0x1fa   :  { %v816_v20 = vsel %vm812_vm13, %v795_v14, %v807_v17  ;;  %v815_v25 = vsel %vm812_vm13, %v793_v15, %v805_v23 }
 0x1fb   :  { %v823_v28 = vsel %vm1541_vm0, %v816_v20, 0.0  ;;  %v822_v29 = vsel %vm1541_vm0, %v815_v25, 0.0 }
 0x1fc   :  { %v827_v30 = vadd.f32 %v823_v28, %v783_v24  ;;  %v826_v31 = vadd.f32 %v822_v29, %v782_v26 }
 0x1fe   :  { %832 = vst.msk [vmem:[%s1591_s2 + $0x18] sm:$0xff] %vm828_vm15, %v827_v30  ;;  %831 = vst.msk [vmem:[%s1591_s2 + $0x10] sm:$0xff] %vm828_vm15, %v826_v31 }
 0x1ff   :  { %837 = vsyncpa [#allocation3], 1 }

</bundles_post_ra>
